<compile_context>
chip_gen: v7x
topology: tpu7x:2x2x1
jax: 0.10.0
libtpu: 0.0.40
codegen_flags: <defaults>
</compile_context>

<pallas_src>
import jax
import jax.numpy as jnp
from jax import lax
from jax.experimental import pallas as pl
from jax.experimental.pallas import tpu as pltpu


def multimodal_kernel(ids_ref, mask_ref, img_ref,
                      w_text_ref, w_img_ref, b_fused_ref,
                      w2_ref, b2_ref, out_ref):
    ids = ids_ref[...]                                  # (Bp, S) int32
    mask = mask_ref[...]                                # (Bp, S) f32
    Bp, S = ids.shape
    V = w_text_ref.shape[0]

    # ---- text branch (fused gather + masked mean pool + folded projections) --
    # pooled_txt @ w_txt @ W1[:H]  ==  tok_hist @ (emb @ w_txt @ W1[:H])
    # where tok_hist[b, v] = sum_s mask_n[b, s] * (ids[b, s] == v).
    denom = jnp.maximum(jnp.sum(mask, axis=1, keepdims=True), 1.0)
    mask_n = mask / denom         # exact divide: approx reciprocal risks 1e-4 tol
    iota_v = lax.broadcasted_iota(jnp.int32, (Bp, S, V), 2)
    weighted_onehot = jnp.where(ids[:, :, None] == iota_v,
                                mask_n[:, :, None], 0.0)          # (Bp, S, V)
    tok_hist = jnp.sum(weighted_onehot, axis=1)                   # (Bp, V)
    h_text = jnp.dot(tok_hist, w_text_ref[...],
                     preferred_element_type=jnp.float32)          # (Bp, H)

    # ---- image branch (spatial sum; 1/HW already folded into w_img_ref) -----
    img_sum = jnp.sum(img_ref[...], axis=2)                       # (Bp, C)
    h_img = jnp.dot(img_sum, w_img_ref[...],
                    preferred_element_type=jnp.float32)           # (Bp, H)

    # ---- fusion head: ReLU(concat @ W1 + b1) with W1/biases pre-folded ------
    h = jnp.maximum(h_text + h_img + b_fused_ref[...], 0.0)       # (Bp, H)
    # Dropout(0.3): identity at inference time (eval mode).
    out_ref[...] = (jnp.dot(h, w2_ref[...],
                            preferred_element_type=jnp.float32)
                    + b2_ref[...])                                # (Bp, NCpad)


def fuse_params(params, spatial_hw):
    """Algebraically fold the linear chains ONCE at init (no nonlinearity
    between the branch projections and the first fusion Linear)."""
    H = params["w_txt"].shape[0]
    w1_t = params["w1"][:H, :]
    w1_i = params["w1"][H:, :]
    w_text_all = params["emb"] @ params["w_txt"] @ w1_t                 # (V, H)
    w_img_all = (params["w_img"] @ w1_i) / float(spatial_hw)            # (C, H)
    b_fused = (params["b1"] + params["b_txt"] @ w1_t
               + params["b_img"] @ w1_i)                                # (1, H)

    num_classes = params["w2"].shape[1]
    nc_pad = max(128, ((num_classes + 127) // 128) * 128)   # lane-dense output
    w2_pad = jnp.zeros((H, nc_pad), jnp.float32).at[:, :num_classes].set(
        params["w2"].astype(jnp.float32))
    b2_pad = jnp.zeros((1, nc_pad), jnp.float32).at[:, :num_classes].set(
        params["b2"].astype(jnp.float32))

    return {"w_text_all": w_text_all.astype(jnp.float32),
            "w_img_all": w_img_all.astype(jnp.float32),
            "b_fused": b_fused.astype(jnp.float32),
            "w2_pad": w2_pad, "b2_pad": b2_pad,
            "num_classes": num_classes}


def multimodal_forward(input_ids, attention_mask, image, fused):
    """input_ids: (B, S) int; attention_mask: (B, S); image: (B, C, H, W)."""
    B, S = input_ids.shape
    _, C, Hs, Ws = image.shape
    Bp = ((B + 7) // 8) * 8                 # pad M to full f32 sublane width
    nc_pad = fused["w2_pad"].shape[1]

    # Glue: zero-pad the batch rows and flatten NCHW spatial dims.
    ids = jnp.zeros((Bp, S), jnp.int32).at[:B].set(input_ids.astype(jnp.int32))
    mask = jnp.zeros((Bp, S), jnp.float32).at[:B].set(
        attention_mask.astype(jnp.float32))
    img = jnp.zeros((Bp, C, Hs * Ws), jnp.float32).at[:B].set(
        image.reshape(B, C, Hs * Ws).astype(jnp.float32))

    vmem = pl.BlockSpec(memory_space=pltpu.MemorySpace.VMEM)
    out = pl.pallas_call(
        multimodal_kernel,
        out_shape=jax.ShapeDtypeStruct((Bp, nc_pad), jnp.float32),
        in_specs=[vmem] * 8,
        out_specs=vmem,
    )(ids, mask, img,
      fused["w_text_all"], fused["w_img_all"], fused["b_fused"],
      fused["w2_pad"], fused["b2_pad"])

    return out[:B, :fused["num_classes"]]


def reference_forward(input_ids, attention_mask, image, params):
    """Pure-JAX reference with the ORIGINAL (unfused) parameters."""
    text_emb = params["emb"][input_ids].astype(jnp.float32)
    mask = attention_mask.astype(jnp.float32)
    denom = jnp.maximum(jnp.sum(mask, axis=1, keepdims=True), 1.0)
    pooled_txt = jnp.sum(text_emb * mask[:, :, None], axis=1) / denom
    text_features = pooled_txt @ params["w_txt"] + params["b_txt"]

    B, C, Hs, Ws = image.shape
    pooled_img = jnp.mean(image.reshape(B, C, Hs * Ws).astype(jnp.float32), axis=2)
    image_features = pooled_img @ params["w_img"] + params["b_img"]

    combined = jnp.concatenate([text_features, image_features], axis=1)
    h = jnp.maximum(combined @ params["w1"] + params["b1"], 0.0)
    return h @ params["w2"] + params["b2"]


def init_params(key, vocab=32, hidden=128, img_channels=4, num_classes=2):
    ks = jax.random.split(key, 8)
    s = 0.02
    return {
        "emb":   s * jax.random.normal(ks[0], (vocab, hidden), jnp.float32),
        "w_txt": s * jax.random.normal(ks[1], (hidden, hidden), jnp.float32),
        "b_txt": jnp.zeros((1, hidden), jnp.float32),
        "w_img": s * jax.random.normal(ks[2], (img_channels, hidden), jnp.float32),
        "b_img": jnp.zeros((1, hidden), jnp.float32),
        "w1":    s * jax.random.normal(ks[3], (2 * hidden, hidden), jnp.float32),
        "b1":    s * jax.random.normal(ks[4], (1, hidden), jnp.float32),
        "w2":    s * jax.random.normal(ks[5], (hidden, num_classes), jnp.float32),
        "b2":    s * jax.random.normal(ks[6], (1, num_classes), jnp.float32),
    }


if __name__ == "__main__":
    B, S, HIDDEN = 2, 8, 128
    C, SP = 4, 16
    VOCAB, NUM_CLASSES = 32, 2

    key = jax.random.PRNGKey(0)
    k_ids, k_img, k_params = jax.random.split(key, 3)

    input_ids = jax.random.randint(k_ids, (B, S), 0, VOCAB, dtype=jnp.int32)
    attention_mask = jnp.concatenate(
        [jnp.ones((B, S - 2), jnp.float32), jnp.zeros((B, 2), jnp.float32)], axis=1)
    image = jax.random.normal(k_img, (B, C, SP, SP), jnp.float32)  # NCHW

    params = init_params(k_params, vocab=VOCAB, hidden=HIDDEN,
                         img_channels=C, num_classes=NUM_CLASSES)
    fused = fuse_params(params, spatial_hw=SP * SP)   # one-time weight folding

    out = multimodal_forward(input_ids, attention_mask, image, fused)
    out = jax.block_until_ready(out)

    ref = reference_forward(input_ids, attention_mask, image, params)
    assert out.shape == (B, NUM_CLASSES)
    assert jnp.allclose(out, ref, atol=1e-4, rtol=1e-4), (out, ref)

    print("KERNEL_OK")
</pallas_src>

<mosaic_0001>
module attributes {stable_mosaic.version = 11 : i64} {
  func.func @multimodal_kernel(%arg0: memref<8x8xi32, #tpu.memory_space<vmem>>, %arg1: memref<8x8xf32, #tpu.memory_space<vmem>>, %arg2: memref<8x4x256xf32, #tpu.memory_space<vmem>>, %arg3: memref<32x128xf32, #tpu.memory_space<vmem>>, %arg4: memref<4x128xf32, #tpu.memory_space<vmem>>, %arg5: memref<1x128xf32, #tpu.memory_space<vmem>>, %arg6: memref<128x128xf32, #tpu.memory_space<vmem>>, %arg7: memref<1x128xf32, #tpu.memory_space<vmem>>, %arg8: memref<8x128xf32, #tpu.memory_space<vmem>>) attributes {dimension_semantics = [], scalar_prefetch = 0 : i64, scratch_operands = 0 : i64, tpu.core_type = #tpu.core_type<tc>} {
    %c0 = arith.constant 0 : index
    %c0_0 = arith.constant 0 : index
    %0 = vector.load %arg0[%c0, %c0_0] : memref<8x8xi32, #tpu.memory_space<vmem>>, vector<8x8xi32>
    %c0_1 = arith.constant 0 : index
    %c0_2 = arith.constant 0 : index
    %1 = vector.load %arg1[%c0_1, %c0_2] : memref<8x8xf32, #tpu.memory_space<vmem>>, vector<8x8xf32>
    %cst = arith.constant dense<0.000000e+00> : vector<8xf32>
    %2 = vector.multi_reduction <add>, %1, %cst [1] : vector<8x8xf32> to vector<8xf32>
    %3 = vector.shape_cast %2 : vector<8xf32> to vector<8x1xf32>
    %cst_3 = arith.constant 1.000000e+00 : f32
    %4 = vector.broadcast %cst_3 : f32 to vector<8x1xf32>
    %5 = arith.maximumf %3, %4 : vector<8x1xf32>
    %6 = vector.broadcast %5 : vector<8x1xf32> to vector<8x8xf32>
    %7 = arith.divf %1, %6 : vector<8x8xf32>
    %8 = tpu.iota {dimensions = array<i32: 2>} : vector<8x8x32xi32>
    %9 = vector.shape_cast %0 : vector<8x8xi32> to vector<8x8x1xi32>
    %10 = vector.broadcast %9 : vector<8x8x1xi32> to vector<8x8x32xi32>
    %11 = arith.cmpi eq, %10, %8 : vector<8x8x32xi32>
    %12 = vector.shape_cast %7 : vector<8x8xf32> to vector<8x8x1xf32>
    %cst_4 = arith.constant 0.000000e+00 : f32
    %13 = vector.shape_cast %12 : vector<8x8x1xf32> to vector<8x8x1xf32>
    %14 = vector.broadcast %13 : vector<8x8x1xf32> to vector<8x8x32xf32>
    %15 = vector.broadcast %cst_4 : f32 to vector<8x8x32xf32>
    %16 = arith.select %11, %14, %15 : vector<8x8x32xi1>, vector<8x8x32xf32>
    %cst_5 = arith.constant dense<0.000000e+00> : vector<8x32xf32>
    %17 = vector.multi_reduction <add>, %16, %cst_5 [1] : vector<8x8x32xf32> to vector<8x32xf32>
    %c0_6 = arith.constant 0 : index
    %c0_7 = arith.constant 0 : index
    %18 = vector.load %arg3[%c0_6, %c0_7] : memref<32x128xf32, #tpu.memory_space<vmem>>, vector<32x128xf32>
    %cst_8 = arith.constant dense<0.000000e+00> : vector<8x128xf32>
    %19 = tpu.matmul %17, %18, %cst_8 {dimension_numbers = #tpu.dot_dimension_numbers<[1], [0], [0], [1], [0, 0, 1, 1], [], []>} : vector<8x32xf32>, vector<32x128xf32>, vector<8x128xf32> -> vector<8x128xf32>
    %c0_9 = arith.constant 0 : index
    %c0_10 = arith.constant 0 : index
    %c0_11 = arith.constant 0 : index
    %20 = vector.load %arg2[%c0_9, %c0_10, %c0_11] : memref<8x4x256xf32, #tpu.memory_space<vmem>>, vector<8x4x256xf32>
    %cst_12 = arith.constant dense<0.000000e+00> : vector<8x4xf32>
    %21 = vector.multi_reduction <add>, %20, %cst_12 [2] : vector<8x4x256xf32> to vector<8x4xf32>
    %c0_13 = arith.constant 0 : index
    %c0_14 = arith.constant 0 : index
    %22 = vector.load %arg4[%c0_13, %c0_14] : memref<4x128xf32, #tpu.memory_space<vmem>>, vector<4x128xf32>
    %cst_15 = arith.constant dense<0.000000e+00> : vector<8x128xf32>
    %23 = tpu.matmul %21, %22, %cst_15 {dimension_numbers = #tpu.dot_dimension_numbers<[1], [0], [0], [1], [0, 0, 1, 1], [], []>} : vector<8x4xf32>, vector<4x128xf32>, vector<8x128xf32> -> vector<8x128xf32>
    %24 = arith.addf %19, %23 : vector<8x128xf32>
    %c0_16 = arith.constant 0 : index
    %c0_17 = arith.constant 0 : index
    %25 = vector.load %arg5[%c0_16, %c0_17] : memref<1x128xf32, #tpu.memory_space<vmem>>, vector<1x128xf32>
    %26 = vector.broadcast %25 : vector<1x128xf32> to vector<8x128xf32>
    %27 = arith.addf %24, %26 : vector<8x128xf32>
    %cst_18 = arith.constant 0.000000e+00 : f32
    %28 = vector.broadcast %cst_18 : f32 to vector<8x128xf32>
    %29 = arith.maximumf %27, %28 : vector<8x128xf32>
    %c0_19 = arith.constant 0 : index
    %c0_20 = arith.constant 0 : index
    %30 = vector.load %arg6[%c0_19, %c0_20] : memref<128x128xf32, #tpu.memory_space<vmem>>, vector<128x128xf32>
    %cst_21 = arith.constant dense<0.000000e+00> : vector<8x128xf32>
    %31 = tpu.matmul %29, %30, %cst_21 {dimension_numbers = #tpu.dot_dimension_numbers<[1], [0], [0], [1], [0, 0, 1, 1], [], []>} : vector<8x128xf32>, vector<128x128xf32>, vector<8x128xf32> -> vector<8x128xf32>
    %c0_22 = arith.constant 0 : index
    %c0_23 = arith.constant 0 : index
    %32 = vector.load %arg7[%c0_22, %c0_23] : memref<1x128xf32, #tpu.memory_space<vmem>>, vector<1x128xf32>
    %33 = vector.broadcast %32 : vector<1x128xf32> to vector<8x128xf32>
    %34 = arith.addf %31, %33 : vector<8x128xf32>
    %c0_24 = arith.constant 0 : index
    %c0_25 = arith.constant 0 : index
    %35 = vector.load %arg8[%c0_24, %c0_25] : memref<8x128xf32, #tpu.memory_space<vmem>>, vector<8x128xf32>
    tpu.vector_store %arg8[%c0_24, %c0_25], %34 {strides = array<i32>} : memref<8x128xf32, #tpu.memory_space<vmem>>, vector<8x128xf32>,
    return
  }
}

</mosaic_0001>

<bundles_post_ra>
// kernel: tpu_custom_call.1
= control target key start
LH: loop header
LB: loop body
LE: loop exit
PB: predicated region body
PF: predicated region fallthrough
CT: control target
= control target key end

     0   :  { %13 = vsyncpa [#allocation3], 0  ;;  %s1225_s0 = inlined_call_operand.hbm [shape: s32[8,8], index: 0, kind: input, shape index: {}]   ;;  %s1226_s1 = inlined_call_operand.hbm [shape: f32[8,8], index: 1, kind: input, shape index: {}]   ;;  %s1227_s2 = inlined_call_operand.hbm [shape: f32[8,4,256], index: 2, kind: input, shape index: {}]   ;;  %s1228_s3 = inlined_call_operand.hbm [shape: f32[32,128], index: 3, kind: input, shape index: {}]   ;;  %s1229_s4 = inlined_call_operand.vmem [shape: f32[4,128], index: 4, kind: input, shape index: {}]   ;;  %s1230_s5 = inlined_call_operand.vmem [shape: f32[1,128], index: 5, kind: input, shape index: {}]   ;;  %s1231_s6 = inlined_call_operand.hbm [shape: f32[128,128], index: 6, kind: input, shape index: {}]   ;;  %s1232_s7 = inlined_call_operand.vmem [shape: f32[1,128], index: 7, kind: input, shape index: {}]   ;;  %s1233_s8 = inlined_call_operand.hbm [shape: f32[8,128], index: 8, kind: output, shape index: {}]  }
   0x1   :  { %14 = vsyncpa [#allocation6], 0 }
   0x2   :  { %15 = vsyncpa [#allocation9], 0 }
   0x3   :  { %16 = vsyncpa [#allocation4], 0  ;;  %s976_s27 = smov [#allocation5]   ;;  %s836_s9 = scalar_lea.hbm %s1226_s1, 128 }
   0x4   :  { %s33_s28 = sshll.u32 %s976_s27, 4  ;;  %p837_p0 = scmp.ne.s32.totalorder %s1226_s1, %s836_s9  ;;  %s34_s28 = int_to_ptr.vmem [resolvable:$true] %s33_s28 }
   0x5   :  { %p840_p1 = scmp.lt.u32.totalorder %s836_s9, %s1226_s1 }
   0x7   :  { %p842_p2 = pnand %p840_p1, %p837_p0 }
   0x9   :  { %845 = shalt.err (!%p842_p2)
}
   0xa   :  { %s846_s14 = scalar_lea.vmem %s34_s28, 128  ;;  %p851_p4 = scmp.lt.s32.totalorder %s34_s28, %s34_s28 }
   0xb   :  { %p847_p3 = scmp.ne.s32.totalorder %s34_s28, %s846_s14  ;;  %p852_p5 = scmp.lt.s32.totalorder %s846_s14, %s846_s14 }
   0xd   :  { %p853_p6 = por %p852_p5, %p851_p4 }
   0xf   :  { %p854_p7 = pnand %p853_p6, %p847_p3 }
  0x11   :  { %857 = shalt.err (!%p854_p7)
}
  0x12   :  { %36 = dma.hbm_to_vmem [thread:$0]  %s1226_s1, 128, %s34_s28, [#allocation6]  }
  0x13   :  { %s977_s17 = smov [#allocation8]   ;;  %s978_s19 = smov [#allocation2]  }
  0x14   :  { %s54_s18 = sshll.u32 %s977_s17, 4  ;;  %s23_s20 = sshll.u32 %s978_s19, 4  ;;  %s55_s18 = int_to_ptr.vmem [resolvable:$true] %s54_s18  ;;  %s24_s20 = int_to_ptr.vmem [resolvable:$true] %s23_s20 }
  0x15   :  { %s858_s23 = scalar_lea.hbm %s1228_s3, 512 }
  0x16   :  { %p859_p8 = scmp.ne.s32.totalorder %s1228_s3, %s858_s23  ;;  %p862_p9 = scmp.lt.u32.totalorder %s858_s23, %s1228_s3 }
  0x18   :  { %p864_p10 = pnand %p862_p9, %p859_p8 }
  0x1a   :  { %867 = shalt.err (!%p864_p10)
}
  0x1b   :  { %s868_s1 = scalar_lea.vmem %s55_s18, 512  ;;  %p873_p12 = scmp.lt.s32.totalorder %s55_s18, %s55_s18 }
  0x1c   :  { %p869_p11 = scmp.ne.s32.totalorder %s55_s18, %s868_s1  ;;  %p874_p13 = scmp.lt.s32.totalorder %s868_s1, %s868_s1 }
  0x1e   :  { %p875_p0 = por %p874_p13, %p873_p12 }
  0x20   :  { %p876_p1 = pnand %p875_p0, %p869_p11 }
  0x22   :  { %879 = shalt.err (!%p876_p1)
}
  0x23   :  { %s979_s28 = smov 128   ;;  %s980_s29 = smov 8  }
  0x24   :  { %60 = dma.hbm_to_vmem [thread:$0]  %s1228_s3, 512, %s55_s18, [#allocation9], %s979_s28, %s979_s28, %s980_s29  }
  0x25   :  { %s880_s12 = scalar_lea.hbm %s1225_s0, 128 }
  0x26   :  { %p881_p2 = scmp.ne.s32.totalorder %s1225_s0, %s880_s12  ;;  %p884_p3 = scmp.lt.u32.totalorder %s880_s12, %s1225_s0 }
  0x28   :  { %p886_p4 = pnand %p884_p3, %p881_p2 }
  0x2a   :  { %889 = shalt.err (!%p886_p4)
}
  0x2b   :  { %s890_s17 = scalar_lea.vmem %s24_s20, 128  ;;  %p895_p6 = scmp.lt.s32.totalorder %s24_s20, %s24_s20 }
  0x2c   :  { %p891_p5 = scmp.ne.s32.totalorder %s24_s20, %s890_s17  ;;  %p896_p7 = scmp.lt.s32.totalorder %s890_s17, %s890_s17 }
  0x2e   :  { %p897_p8 = por %p896_p7, %p895_p6 }
  0x30   :  { %p898_p9 = pnand %p897_p8, %p891_p5 }
  0x32   :  { %901 = shalt.err (!%p898_p9)
}
  0x33   :  { %26 = dma.hbm_to_vmem [thread:$0]  %s1225_s0, 128, %s24_s20, [#allocation3]  }
  0x34   :  { %s981_s19 = smov [#allocation7]   ;;  %s982_s22 = smov [#allocation10]  }
  0x35   :  { %s42_s21 = sshll.u32 %s981_s19, 4  ;;  %s70_s23 = sshll.u32 %s982_s22, 4  ;;  %s43_s21 = int_to_ptr.vmem [resolvable:$true] %s42_s21  ;;  %s71_s23 = int_to_ptr.vmem [resolvable:$true] %s70_s23 }
  0x36   :  { %s902_s26 = scalar_lea.hbm %s1227_s2, 1024 }
  0x37   :  { %p903_p10 = scmp.ne.s32.totalorder %s1227_s2, %s902_s26  ;;  %p906_p11 = scmp.lt.u32.totalorder %s902_s26, %s1227_s2 }
  0x39   :  { %p908_p12 = pnand %p906_p11, %p903_p10 }
  0x3b   :  { %911 = shalt.err (!%p908_p12)
}
  0x3c   :  { %s912_s0 = scalar_lea.vmem %s43_s21, 1024  ;;  %p917_p0 = scmp.lt.s32.totalorder %s43_s21, %s43_s21 }
  0x3d   :  { %p913_p13 = scmp.ne.s32.totalorder %s43_s21, %s912_s0  ;;  %p918_p1 = scmp.lt.s32.totalorder %s912_s0, %s912_s0 }
  0x3f   :  { %p919_p2 = por %p918_p1, %p917_p0 }
  0x41   :  { %p920_p3 = pnand %p919_p2, %p913_p13 }
  0x43   :  { %923 = shalt.err (!%p920_p3)
}
  0x44   :  { %48 = dma.hbm_to_vmem [thread:$0]  %s1227_s2, 1024, %s43_s21, [#allocation6], %s979_s28, %s979_s28, %s980_s29  }
  0x45   :  { %s924_s13 = scalar_lea.hbm %s1231_s6, 2048 }
  0x46   :  { %p925_p4 = scmp.ne.s32.totalorder %s1231_s6, %s924_s13  ;;  %p928_p5 = scmp.lt.u32.totalorder %s924_s13, %s1231_s6 }
  0x48   :  { %p930_p6 = pnand %p928_p5, %p925_p4 }
  0x4a   :  { %933 = shalt.err (!%p930_p6)
}
  0x4b   :  { %s934_s3 = scalar_lea.vmem %s71_s23, 2048  ;;  %p939_p8 = scmp.lt.s32.totalorder %s71_s23, %s71_s23 }
  0x4c   :  { %p935_p7 = scmp.ne.s32.totalorder %s71_s23, %s934_s3  ;;  %p940_p9 = scmp.lt.s32.totalorder %s934_s3, %s934_s3 }
  0x4e   :  { %p941_p10 = por %p940_p9, %p939_p8 }
  0x50   :  { %p942_p11 = pnand %p941_p10, %p935_p7 }
  0x52   :  { %945 = shalt.err (!%p942_p11)
}
  0x53   :  { %76 = dma.hbm_to_vmem [thread:$0]  %s1231_s6, 2048, %s71_s23, [#allocation9], %s979_s28, %s979_s28, %s980_s29  }
  0x54   :  { %968 = dma.done.wait [#allocation3], 128  }
  0x55   :  { %969 = vsyncadd [#allocation3], 4294967168 }
  0x56   :  { %970 = dma.done.wait [#allocation6], 1152  }
  0x57   :  { %971 = vsyncadd [#allocation6], 4294966144 }
  0x58   :  { %972 = dma.done.wait [#allocation9], 2560  }
  0x59   :  { %973 = vsyncadd [#allocation9], 4294964736  ;;  %vm96_vm0 = vcmask 64512   ;;  %vm326_vm1 = vcmask 1043456   ;;  %v1101_v0 = vld [vmem:[#allocation5] sm:$0xff]  ;;  %v294_v1 = vld [vmem:[#allocation7] sm:$0xff]  ;;  %v103_v42 = vlaneseq }
  0x5a   :  { %v297_v2 = vld [vmem:[#allocation7 + $0x18] sm:$0xff]  ;;  %v97_v3 = vsel %vm96_vm0, %v1101_v0, 0.0  ;;  %v310_v4 = vcombine.high %v294_v1, %v294_v1  ;;  %v327_v5 = vsel %vm326_vm1, %v294_v1, 0.0  ;;  %v295_v7 = vld [vmem:[#allocation7 + $0x8] sm:$0xff]  ;;  %v296_v9 = vld [vmem:[#allocation7 + $0x10] sm:$0xff]  ;;  %v983_v62 = vmov 0.0  }
  0x5b   :  { %v313_v6 = vcombine.high %v297_v2, %v297_v2  ;;  %v299_v8 = vld [vmem:[#allocation7 + $0x28] sm:$0xff]  ;;  %98 = vadd.xlane.f32.xlu0 %v97_v3  ;;  %v342_v10 = vsel %vm326_vm1, %v297_v2, 0.0  ;;  %v311_v11 = vcombine.high %v295_v7, %v295_v7  ;;  %v332_v12 = vsel %vm326_vm1, %v295_v7, 0.0  ;;  %v298_v17 = vld [vmem:[#allocation7 + $0x20] sm:$0xff]  ;;  %v301_v20 = vld [vmem:[#allocation7 + $0x38] sm:$0xff]  ;;  %734 = vmatprep.subr.mxu1 %v983_v62  ;;  %s986_s22 = smov [#allocation11]  }
  0x5c   :  { %v328_v13 = vsel %vm326_vm1, %v310_v4, 0.0  ;;  %v315_v15 = vcombine.high %v299_v8, %v299_v8  ;;  %v312_v16 = vcombine.high %v296_v9, %v296_v9  ;;  %v337_v22 = vsel %vm326_vm1, %v296_v9, 0.0  ;;  %v300_v24 = vld [vmem:[#allocation7 + $0x30] sm:$0xff]  ;;  %s694_s23 = sshll.u32 %s986_s22, 4  ;;  %s695_s23 = int_to_ptr.vmem [resolvable:$true] %s694_s23 }
  0x5d   :  { %v343_v14 = vsel %vm326_vm1, %v313_v6, 0.0  ;;  %v329_v18 = vadd.f32 %v328_v13, %v327_v5  ;;  %v333_v19 = vsel %vm326_vm1, %v311_v11, 0.0  ;;  %v314_v26 = vcombine.high %v298_v17, %v298_v17  ;;  %v94_v45 = vld [vmem:[#allocation2] sm:$0xff]  ;;  %s946_s24 = scalar_lea.vmem %s695_s23, 128  ;;  %p951_p13 = scmp.lt.s32.totalorder %s695_s23, %s695_s23 }
  0x5e   :  { %v334_v21 = vadd.f32 %v333_v19, %v332_v12  ;;  %v338_v23 = vsel %vm326_vm1, %v312_v16, 0.0  ;;  %v344_v25 = vadd.f32 %v343_v14, %v342_v10  ;;  %v352_v27 = vsel %vm326_vm1, %v299_v8, 0.0  ;;  %v367_v61 = vld [vmem:[%s1229_s4] sm:$0xf]  ;;  %p947_p12 = scmp.ne.s32.totalorder %s695_s23, %s946_s24  ;;  %p952_p0 = scmp.lt.s32.totalorder %s946_s24, %s946_s24 }
  0x5f   :  { %330 = vadd.xlane.f32.xlu0 %v329_v18  ;;  %v353_v28 = vsel %vm326_vm1, %v315_v15, 0.0  ;;  %v339_v29 = vadd.f32 %v338_v23, %v337_v22  ;;  %v317_v30 = vcombine.high %v301_v20, %v301_v20  ;;  %v347_v31 = vsel %vm326_vm1, %v298_v17, 0.0  ;;  %735 = vmatpush3.msk.msra.mxu1 %vm326_vm1, %v367_v61 }
  0x60   :  { %335 = vadd.xlane.f32.xlu1 %v334_v21  ;;  %v348_v32 = vsel %vm326_vm1, %v314_v26, 0.0  ;;  %v316_v33 = vcombine.high %v300_v24, %v300_v24  ;;  %v354_v34 = vadd.f32 %v353_v28, %v352_v27  ;;  %v362_v35 = vsel %vm326_vm1, %v301_v20, 0.0  ;;  %p953_p1 = por %p952_p0, %p951_p13 }
  0x61   :  { %v363_v36 = vsel %vm326_vm1, %v317_v30, 0.0  ;;  %v349_v37 = vadd.f32 %v348_v32, %v347_v31  ;;  %v357_v38 = vsel %vm326_vm1, %v300_v24, 0.0  ;;  %v1120_v43 = vshrl.u32 %v103_v42, 7 }
  0x62   :  { %v358_v39 = vsel %vm326_vm1, %v316_v33, 0.0  ;;  %v364_v40 = vadd.f32 %v363_v36, %v362_v35  ;;  %vm984_vm2 = vmmov 0   ;;  %v1148_v63 = vand.u32 127, %v103_v42  ;;  %v290_v35 = vld [vmem:[#allocation8] sm:$0xff]  ;;  %v291_v36 = vld [vmem:[#allocation8 + $0x8] sm:$0xff]  ;;  %p954_p2 = pnand %p953_p1, %p947_p12 }
  0x63   :  { %345 = vadd.xlane.f32.xlu0 %v344_v25  ;;  %v359_v41 = vadd.f32 %v358_v39, %v357_v38  ;;  %v107_v44 = vsub.s32 0, %v1120_v43  ;;  %v114_v46 = vsub.s32 1, %v1120_v43  ;;  %v121_v48 = vsub.s32 2, %v1120_v43  ;;  %736 = vmatprep.mubr.msk.f32.mxu1 %vm984_vm2, %v983_v62 }
  0x64   :  { %340 = vadd.xlane.f32.xlu1 %v339_v29  ;;  %v128_v50 = vsub.s32 3, %v1120_v43  ;;  %v135_v53 = vsub.s32 4, %v1120_v43  ;;  %v142_v55 = vsub.s32 5, %v1120_v43  ;;  %v149_v57 = vsub.s32 6, %v1120_v43  ;;  %782 = vmatprep.mubr.msk.f32.mxu0 %vm984_vm2, %v983_v62 }
  0x65   :  { %v108_v47 = vrot.slane %v94_v45, %v107_v44  ;;  %v115_v49 = vrot.slane %v94_v45, %v114_v46  ;;  %v122_v51 = vrot.slane %v94_v45, %v121_v48  ;;  %v156_v59 = vsub.s32 7, %v1120_v43 }
  0x66   :  { %v129_v52 = vrot.slane %v94_v45, %v128_v50  ;;  %v136_v54 = vrot.slane %v94_v45, %v135_v53  ;;  %v143_v56 = vrot.slane %v94_v45, %v142_v55  ;;  %v150_v58 = vrot.slane %v94_v45, %v149_v57 }
  0x67   :  { %355 = vadd.xlane.f32.xlu0 %v354_v34  ;;  %v157_v60 = vrot.slane %v94_v45, %v156_v59  ;;  %v378_v3 = vsub.s32 %v1148_v63, %v1120_v43  ;;  %vm408_vm3 = vcmask 1041409   ;;  %vm410_vm4 = vcmask 1042434   ;;  %v594_v45 = vld [vmem:[#allocation10] sm:$0xff]  ;;  %v599_v43 = vld [vmem:[#allocation10 + $0x28] sm:$0xff] }
  0x68   :  { %350 = vadd.xlane.f32.xlu1 %v349_v37  ;;  %vm412_vm5 = vcmask 1043459   ;;  %vm414_vm6 = vcmask 1044484   ;;  %vm416_vm7 = vcmask 1045509   ;;  %vm418_vm8 = vcmask 1046534  }
  0x69   :  { %vm420_vm9 = vcmask 1047559   ;;  %vm422_vm10 = vcmask 31744   ;;  %v786_v37 = vpack.c.bf16 %v291_v36, %v290_v35  ;;  %v985_v38 = vmov 0.0|0.0  }
  0x6a   :  { %785 = vmatprep.subr.bf16.mxu1 %v985_v38  ;;  %791 = vmatprep.subr.bf16.mxu0 %v985_v38  ;;  %vm233_vm13 = vcmask 261120  }
  0x6b   :  { %365 = vadd.xlane.f32.xlu0 %v364_v40  ;;  %v292_v40 = vld [vmem:[#allocation8 + $0x10] sm:$0xff] }
  0x6c   :  { %360 = vadd.xlane.f32.xlu1 %v359_v41  ;;  %v293_v41 = vld [vmem:[#allocation8 + $0x18] sm:$0xff] }
  0x6d   :  { %v789_v42 = vpack.c.bf16 %v293_v41, %v292_v40 }
  0x7d   :  { %110 = vbcast.lane.b32.xlu1 %v108_v47, 256  ;;  %v596_v47 = vld [vmem:[#allocation10 + $0x10] sm:$0xff] }
  0x81   :  { %117 = vbcast.lane.b32.xlu0 %v115_v49, 256  ;;  %124 = vbcast.lane.b32.xlu1 %v122_v51, 256  ;;  %v597_v49 = vld [vmem:[#allocation10 + $0x18] sm:$0xff]  ;;  %v598_v51 = vld [vmem:[#allocation10 + $0x20] sm:$0xff] }
  0x85   :  { %131 = vbcast.lane.b32.xlu0 %v129_v52, 256 }
  0x89   :  { %138 = vbcast.lane.b32.xlu0 %v136_v54, 256  ;;  %v600_v54 = vld [vmem:[#allocation10 + $0x30] sm:$0xff] }
  0x8d   :  { %145 = vbcast.lane.b32.xlu0 %v143_v56, 256 }
  0x91   :  { %152 = vbcast.lane.b32.xlu0 %v150_v58, 256  ;;  %v602_v58 = vld [vmem:[#allocation10 + $0x40] sm:$0xff] }
  0x95   :  { %159 = vbcast.lane.b32.xlu0 %v157_v60, 256 }
  0xe8   :  { %v99_v1 = vpop.xlane.xlu0 %98 }
  0xe9   :  { %v100_v2 = vmax.f32 %v99_v1, 1.0  ;;  %v605_v1 = vld [vmem:[#allocation10 + $0x58] sm:$0xff] }
  0xeb   :  { %834 = vrcp.f32 %v100_v2 }
  0xec   :  { %v331_v4 = vpop.xlane.xlu0 %330 }
  0xed   :  { %v379_v5 = vrot.slane %v331_v4, %v378_v3  ;;  %v336_v6 = vpop.xlane.xlu1 %335 }
  0xee   :  { %v383_v7 = vrot.slane %v336_v6, %v378_v3 }
  0xf0   :  { %v346_v8 = vpop.xlane.xlu0 %345  ;;  %v409_v9 = vsel %vm408_vm3, %v383_v7, %v379_v5 }
  0xf1   :  { %v341_v10 = vpop.xlane.xlu1 %340  ;;  %v391_v12 = vrot.slane %v346_v8, %v378_v3 }
  0xf2   :  { %v387_v11 = vrot.slane %v341_v10, %v378_v3 }
  0xf4   :  { %v356_v13 = vpop.xlane.xlu0 %355  ;;  %v411_v14 = vsel %vm410_vm4, %v387_v11, %v409_v9 }
  0xf5   :  { %v835_v15 = vpop.eup %834  ;;  %v351_v16 = vpop.xlane.xlu1 %350  ;;  %v399_v19 = vrot.slane %v356_v13, %v378_v3  ;;  %v413_v20 = vsel %vm412_vm5, %v391_v12, %v411_v14 }
  0xf6   :  { %v102_v17 = vmul.f32 %v835_v15, %v1101_v0  ;;  %v395_v18 = vrot.slane %v351_v16, %v378_v3 }
  0xf8   :  { %v221_v21 = vrot.slane %v102_v17, %v156_v59  ;;  %v172_v22 = vrot.slane %v102_v17, %v107_v44  ;;  %v366_v23 = vpop.xlane.xlu0 %365  ;;  %v415_v26 = vsel %vm414_vm6, %v395_v18, %v413_v20  ;;  %v179_v28 = vrot.slane %v102_v17, %v114_v46  ;;  %v595_v46 = vld [vmem:[#allocation10 + $0x8] sm:$0xff] }
  0xf9   :  { %v361_v24 = vpop.xlane.xlu1 %360  ;;  %v407_v25 = vrot.slane %v366_v23, %v378_v3  ;;  %v417_v0 = vsel %vm416_vm7, %v399_v19, %v415_v26  ;;  %v186_v31 = vrot.slane %v102_v17, %v121_v48  ;;  %v193_v32 = vrot.slane %v102_v17, %v128_v50  ;;  %v603_v59 = vld [vmem:[#allocation10 + $0x48] sm:$0xff] }
  0xfa   :  { %223 = vbcast.lane.b32.xlu0 %v221_v21, 256  ;;  %174 = vbcast.lane.b32.xlu1 %v172_v22, 256  ;;  %v403_v27 = vrot.slane %v361_v24, %v378_v3  ;;  %v200_v33 = vrot.slane %v102_v17, %v135_v53  ;;  %v207_v34 = vrot.slane %v102_v17, %v142_v55  ;;  %v601_v55 = vld [vmem:[#allocation10 + $0x38] sm:$0xff] }
  0xfb   :  { %v214_v39 = vrot.slane %v102_v17, %v149_v57  ;;  %v792_v48 = vpack.c.bf16 %v595_v46, %v594_v45  ;;  %v795_v50 = vpack.c.bf16 %v597_v49, %v596_v47  ;;  %v798_v53 = vpack.c.bf16 %v599_v43, %v598_v51 }
  0xfc   :  { %v419_v29 = vsel %vm418_vm8, %v403_v27, %v417_v0  ;;  %v118_v44 = vpop.permute.xlu0 %117  ;;  %v801_v57 = vpack.c.bf16 %v601_v55, %v600_v54  ;;  %v804_v61 = vpack.c.bf16 %v603_v59, %v602_v58 }
  0xfd   :  { %v421_v30 = vsel %vm420_vm9, %v407_v25, %v419_v29  ;;  %793 = vmatpush3.bf16.msra.mxu0 %v792_v48  ;;  %v111_v60 = vpop.permute.xlu1 %110  ;;  %vm162_vm11 = vcmp.eq.s32.totalorder %v118_v44, %v1148_v63 }
  0xfe   :  { %181 = vbcast.lane.b32.xlu1 %v179_v28, 256  ;;  %737 = vmatmul.mubr.msk.f32.vlgmr.msra.gmra.mrb[0].mxu1 %vm422_vm10, %v421_v30  ;;  %vm161_vm12 = vcmp.eq.s32.totalorder %v111_v60, %v1148_v63 }
  0xff   :  { %747 = vmatprep.mubr.msk.f32.mxu1 %vm984_vm2, %v983_v62  ;;  %787 = vmatpush3.bf16.msra.mxu1 %v786_v37  ;;  %v604_v62 = vld [vmem:[#allocation10 + $0x50] sm:$0xff] }
 0x100   :  { %788 = vmatprep.subr.bf16.mxu1 %v985_v38  ;;  %794 = vmatprep.subr.bf16.mxu0 %v985_v38  ;;  %v132_v52 = vpop.permute.xlu0 %131  ;;  %v807_v3 = vpack.c.bf16 %v605_v1, %v604_v62 }
 0x101   :  { %796 = vmatpush3.bf16.msra.mxu0 %v795_v50  ;;  %v125_v4 = vpop.permute.xlu1 %124  ;;  %vm164_vm0 = vcmp.eq.s32.totalorder %v132_v52, %v1148_v63 }
 0x102   :  { %188 = vbcast.lane.b32.xlu1 %v186_v31, 256  ;;  %797 = vmatprep.subr.bf16.mxu0 %v985_v38  ;;  %vm163_vm14 = vcmp.eq.s32.totalorder %v125_v4, %v1148_v63 }
 0x103   :  { %790 = vmatpush3.bf16.msra.mxu1 %v789_v42 }
 0x104   :  { %v139_v56 = vpop.permute.xlu0 %138 }
 0x105   :  { %799 = vmatpush3.bf16.msra.mxu0 %v798_v53  ;;  %vm165_vm1 = vcmp.eq.s32.totalorder %v139_v56, %v1148_v63 }
 0x106   :  { %195 = vbcast.lane.b32.xlu1 %v193_v32, 256  ;;  %800 = vmatprep.subr.bf16.mxu0 %v985_v38 }
 0x108   :  { %v146_v2 = vpop.permute.xlu0 %145 }
 0x109   :  { %802 = vmatpush3.bf16.msra.mxu0 %v801_v57  ;;  %vm166_vm2 = vcmp.eq.s32.totalorder %v146_v2, %v1148_v63 }
 0x10a   :  { %202 = vbcast.lane.b32.xlu1 %v200_v33, 256  ;;  %803 = vmatprep.subr.bf16.mxu0 %v985_v38 }
 0x10c   :  { %v153_v5 = vpop.permute.xlu0 %152 }
 0x10d   :  { %805 = vmatpush3.bf16.msra.mxu0 %v804_v61  ;;  %vm167_vm10 = vcmp.eq.s32.totalorder %v153_v5, %v1148_v63 }
 0x10e   :  { %209 = vbcast.lane.b32.xlu1 %v207_v34, 256  ;;  %806 = vmatprep.subr.bf16.mxu0 %v985_v38 }
 0x110   :  { %v160_v7 = vpop.permute.xlu0 %159 }
 0x111   :  { %808 = vmatpush3.bf16.msra.mxu0 %v807_v3  ;;  %vm168_vm15 = vcmp.eq.s32.totalorder %v160_v7, %v1148_v63 }
 0x112   :  { %216 = vbcast.lane.b32.xlu1 %v214_v39, 256  ;;  %809 = vmatprep.subr.bf16.mxu0 %v985_v38 }
 0x16c   :  { %v175_v6 = vpop.permute.xlu1 %174  ;;  %v224_v13 = vpop.permute.xlu0 %223 }
 0x16d   :  { %v225_v10 = vsel %vm161_vm12, %v175_v6, 0.0  ;;  %v232_v19 = vsel %vm168_vm15, %v224_v13, 0.0 }
 0x16e   :  { %v234_v14 = vsel %vm233_vm13, %v225_v10, 0.0  ;;  %v283_v24 = vsel %vm233_vm13, %v232_v19, 0.0 }
 0x16f   :  { %v235_v20 = vrot.slane %v234_v14, 4  ;;  %v284_v30 = vrot.slane %v283_v24, 4 }
 0x170   :  { %v182_v8 = vpop.permute.xlu1 %181 }
 0x171   :  { %v226_v9 = vsel %vm162_vm11, %v182_v8, 0.0  ;;  %v236_v27 = vadd.f32 %v235_v20, %v234_v14  ;;  %v285_v42 = vadd.f32 %v284_v30, %v283_v24 }
 0x172   :  { %v241_v11 = vsel %vm233_vm13, %v226_v9, 0.0 }
 0x173   :  { %v242_v16 = vrot.slane %v241_v11, 4  ;;  %v237_v36 = vrot.slane %v236_v27, 2  ;;  %v286_v54 = vrot.slane %v285_v42, 2 }
 0x174   :  { %v189_v12 = vpop.permute.xlu1 %188 }
 0x175   :  { %v227_v15 = vsel %vm163_vm14, %v189_v12, 0.0  ;;  %v243_v22 = vadd.f32 %v242_v16, %v241_v11  ;;  %v238_v49 = vadd.f32 %v237_v36, %v236_v27  ;;  %v287_v3 = vadd.f32 %v286_v54, %v285_v42  ;;  %v709_v36 = vld [vmem:[%s1232_s7] ss:$0 sm:$0xff] }
 0x176   :  { %v248_v17 = vsel %vm233_vm13, %v227_v15, 0.0 }
 0x177   :  { %v249_v18 = vrot.slane %v248_v17, 4  ;;  %v244_v31 = vrot.slane %v243_v22, 2  ;;  %v239_v60 = vrot.slane %v238_v49, 1  ;;  %v288_v11 = vrot.slane %v287_v3, 1 }
 0x178   :  { %v196_v21 = vpop.permute.xlu1 %195 }
 0x179   :  { %v228_v23 = vsel %vm164_vm0, %v196_v21, 0.0  ;;  %v250_v25 = vadd.f32 %v249_v18, %v248_v17  ;;  %v245_v44 = vadd.f32 %v244_v31, %v243_v22  ;;  %v240_v7 = vadd.f32 %v239_v60, %v238_v49  ;;  %v708_v31 = vld [vmem:[%s1230_s5] ss:$0 sm:$0xff] }
 0x17a   :  { %v255_v26 = vsel %vm233_vm13, %v228_v23, 0.0  ;;  %v289_v19 = vadd.f32 %v288_v11, %v287_v3 }
 0x17b   :  { %v256_v0 = vrot.slane %v255_v26, 4  ;;  %v251_v34 = vrot.slane %v250_v25, 2  ;;  %v246_v55 = vrot.slane %v245_v44, 1 }
 0x17c   :  { %v203_v28 = vpop.permute.xlu1 %202 }
 0x17d   :  { %v229_v29 = vsel %vm165_vm1, %v203_v28, 0.0  ;;  %v257_v32 = vadd.f32 %v256_v0, %v255_v26  ;;  %v252_v46 = vadd.f32 %v251_v34, %v250_v25  ;;  %v247_v63 = vadd.f32 %v246_v55, %v245_v44  ;;  %v606_v25 = vld [vmem:[#allocation10 + $0x60] sm:$0xff]  ;;  %v607_v26 = vld [vmem:[#allocation10 + $0x68] sm:$0xff]  ;;  %v608_v0 = vld [vmem:[#allocation10 + $0x70] sm:$0xff] }
 0x17e   :  { %v262_v33 = vsel %vm233_vm13, %v229_v29, 0.0  ;;  %v810_v27 = vpack.c.bf16 %v607_v26, %v606_v25  ;;  %v609_v28 = vld [vmem:[#allocation10 + $0x78] sm:$0xff] }
 0x17f   :  { %v263_v35 = vrot.slane %v262_v33, 4  ;;  %v258_v37 = vrot.slane %v257_v32, 2  ;;  %v253_v57 = vrot.slane %v252_v46, 1  ;;  %v506_v12 = vsel %vm408_vm3, %v247_v63, %v240_v7 }
 0x180   :  { %v210_v39 = vpop.permute.xlu1 %209  ;;  %811 = vmatpush3.bf16.msra.mxu0 %v810_v27  ;;  %v813_v29 = vpack.c.bf16 %v609_v28, %v608_v0 }
 0x181   :  { %v264_v40 = vadd.f32 %v263_v35, %v262_v33  ;;  %v230_v41 = vsel %vm166_vm2, %v210_v39, 0.0  ;;  %v259_v50 = vadd.f32 %v258_v37, %v257_v32  ;;  %v254_v4 = vadd.f32 %v253_v57, %v252_v46  ;;  %812 = vmatprep.subr.bf16.mxu0 %v985_v38 }
 0x182   :  { %v269_v45 = vsel %vm233_vm13, %v230_v41, 0.0 }
 0x183   :  { %v265_v47 = vrot.slane %v264_v40, 2  ;;  %v270_v48 = vrot.slane %v269_v45, 4  ;;  %v260_v61 = vrot.slane %v259_v50, 1  ;;  %v507_v14 = vsel %vm410_vm4, %v254_v4, %v506_v12 }
 0x184   :  { %v217_v51 = vpop.permute.xlu1 %216  ;;  %814 = vmatpush3.bf16.msra.mxu0 %v813_v29 }
 0x185   :  { %v266_v43 = vadd.f32 %v265_v47, %v264_v40  ;;  %v271_v52 = vadd.f32 %v270_v48, %v269_v45  ;;  %v231_v53 = vsel %vm167_vm10, %v217_v51, 0.0  ;;  %v261_v8 = vadd.f32 %v260_v61, %v259_v50 }
 0x186   :  { %v276_v56 = vsel %vm233_vm13, %v231_v53, 0.0 }
 0x187   :  { %v272_v58 = vrot.slane %v271_v52, 2  ;;  %v277_v59 = vrot.slane %v276_v56, 4  ;;  %v267_v62 = vrot.slane %v266_v43, 1  ;;  %v508_v16 = vsel %vm412_vm5, %v261_v8, %v507_v14 }
 0x189   :  { %v273_v1 = vadd.f32 %v272_v58, %v271_v52  ;;  %v278_v2 = vadd.f32 %v277_v59, %v276_v56  ;;  %v268_v9 = vadd.f32 %v267_v62, %v266_v43 }
 0x18b   :  { %v274_v5 = vrot.slane %v273_v1, 1  ;;  %v279_v6 = vrot.slane %v278_v2, 2  ;;  %v509_v17 = vsel %vm414_vm6, %v268_v9, %v508_v16 }
 0x18d   :  { %v280_v10 = vadd.f32 %v279_v6, %v278_v2  ;;  %v275_v13 = vadd.f32 %v274_v5, %v273_v1 }
 0x18f   :  { %v281_v15 = vrot.slane %v280_v10, 1  ;;  %v510_v20 = vsel %vm416_vm7, %v275_v13, %v509_v17 }
 0x191   :  { %v282_v18 = vadd.f32 %v281_v15, %v280_v10 }
 0x193   :  { %v511_v21 = vsel %vm418_vm8, %v282_v18, %v510_v20 }
 0x194   :  { %v512_v22 = vsel %vm420_vm9, %v289_v19, %v511_v21 }
 0x195   :  { %748 = vmatmul.mubr.msk.f32.vlgmr.msra.gmra.mrb[2].mxu1 %vm233_vm13, %v512_v22 }
 0x1d1   :  { %v494_v23 = vpop.f32.mrb[0].mxu1 }
 0x1d2   :  { %v738_v24 = vpop.f32.mrb[1].mxu1 }
 0x268   :  { %v581_v30 = vpop.f32.mrb[2].mxu1 }
 0x269   :  { %v582_v32 = vadd.f32 %v581_v30, %v494_v23  ;;  %v749_v33 = vpop.f32.mrb[3].mxu1 }
 0x26b   :  { %v592_v34 = vadd.f32 %v708_v31, %v582_v32 }
 0x26d   :  { %v593_v35 = vmax.f32 %v592_v34, 0.0 }
 0x26f   :  { %783 = vmatmul.mubr.f32.vlgmr.msra.gmra.mrb[0].mxu0 %v593_v35 }
 0x342   :  { %v683_v38 = vpop.f32.mrb[0].mxu0 }
 0x343   :  { %v684_v37 = vadd.f32 %v709_v36, %v683_v38  ;;  %v784_v39 = vpop.f32.mrb[1].mxu0 }
 0x345   :  { %687 = vst [vmem:[#allocation11] sm:$0xff] %v684_v37 }
 0x346   :  { %957 = shalt.err (!%p954_p2)
}
 0x347   :  { %s958_s26 = scalar_lea.hbm %s1233_s8, 128 }
 0x348   :  { %p959_p3 = scmp.ne.s32.totalorder %s1233_s8, %s958_s26  ;;  %p962_p4 = scmp.lt.u32.totalorder %s958_s26, %s1233_s8 }
 0x34a   :  { %p964_p5 = pnand %p962_p4, %p959_p3 }
 0x34c   :  { %967 = shalt.err (!%p964_p5)
}
 0x34d   :  { %697 = dma.vmem_to_hbm [thread:$0]  %s695_s23, 128, %s1233_s8, [#allocation4]  }
 0x34e   :  { %974 = dma.done.wait [#allocation4], 128  }
 0x34f   :  { %975 = vsyncadd [#allocation4], 4294967168 }
 0x350   :  { %701 = vsyncpa [#allocation3], 1 }
 0x351   :  { %702 = vsyncpa [#allocation6], 1 }
 0x352   :  { %703 = vsyncpa [#allocation9], 1 }
 0x353   :  { %704 = vsyncpa [#allocation4], 1 }

</bundles_post_ra>
